<compile_context>
chip_gen: v7x
topology: tpu7x:2x2x1
jax: 0.10.0
libtpu: 0.0.40
codegen_flags: <defaults>
</compile_context>

<pallas_src>
import math

import jax
import jax.numpy as jnp
from jax.experimental import pallas as pl
from jax.experimental.pallas import tpu as pltpu


def _cdiv(a, b):
    return -(-a // b)


def _round_up(a, b):
    return _cdiv(a, b) * b


def bn_affine_kernel(z_ref, scale_ref, shift_ref, x_ref):
    # scale/shift broadcast against the z tile:
    #   direct path : z (tn, D)       params (1, D)
    #   packed path : z (tb, K, 128)  params (1, K, 128)
    x_ref[...] = (z_ref[...] * scale_ref[...] + shift_ref[...]).astype(x_ref.dtype)


def batchnorm_forward(z, gamma, beta, batch_mean, batch_var, *,
                      out_dtype=None, force_pallas=False):
    """Forward pass of the normalizing-flow BatchNorm.

    z: (N, D).  gamma/beta/batch_mean/batch_var: (1, D).
    Returns (x, log_det) matching the PyTorch module's forward().
    """
    N, D = z.shape
    out_dtype = jnp.dtype(out_dtype) if out_dtype is not None else z.dtype

    # ---- wrapper-side param folding (tiny (1, D) work, not the hot path) ----
    # NOTE: folding shift = m - beta*scale changes rounding slightly vs the
    # reference (z - beta)*scale + m; within 1e-5 for typical flow params.
    scale = jnp.exp(-gamma) * jnp.sqrt(batch_var)             # (1, D)
    shift = batch_mean - beta * scale                         # (1, D)
    log_det = jnp.sum(-gamma + 0.5 * jnp.log(batch_var))      # scalar, pure JAX

    total = N * D

    # ---- tiny-problem bypass: pallas_call dispatch/step overhead dominates ----
    if total < (64 * 1024) and not force_pallas:
        return (z * scale + shift).astype(out_dtype), log_det

    # ---- per-generation tile budget / scoped-VMEM limit ----
    try:
        vmem_cap = int(pltpu.get_tpu_info().vmem_capacity_bytes)
    except Exception:
        vmem_cap = 64 << 20
    if vmem_cap >= (100 << 20):       # v5e / v6e: 128 MiB physical VMEM
        tile_budget = 8 << 20         # bytes of z per tile
        vmem_limit = 48 << 20         # 2x in + 2x out double buffers + params + slack
    else:                             # v7x: 64 MiB per TensorCore
        tile_budget = 6 << 20
        vmem_limit = 36 << 20

    in_bytes = jnp.dtype(z.dtype).itemsize
    out_bytes = out_dtype.itemsize

    # ---- choose layout path ----
    packed = False
    if D % 128 != 0:
        P = D // math.gcd(D, 128)         # = lcm(D,128)//128
        K = (P * 8) // math.gcd(P, 8)     # = lcm(P, 8) -> sublane-tile aligned period
        # Only pack if the resident (1, K, 128) param pattern stays small
        # relative to the tile budget.
        packed = (K * 128 * in_bytes * 8) <= tile_budget

    if packed:
        rows = _cdiv(total, 128)
        R = _cdiv(rows, K)
        padded = R * K * 128
        z_flat = z.reshape(-1)
        if padded > total:
            z_flat = jnp.pad(z_flat, (0, padded - total))
        # NOTE: the flatten/pad/unflatten should lower to bitcasts/pads. If the
        # HLO ever shows a materialized relayout copy for a given shape, prefer
        # the direct (tn, D) path below instead.
        z_p = z_flat.reshape(R, K, 128)

        # Channel of flat position f is f % D.  One (K, 128) block covers a
        # whole multiple of the repeat period, and every z block starts at a
        # multiple of K*128, so this single pattern broadcasts over all tiles.
        ch = jnp.arange(K * 128) % D
        scale_p = scale.reshape(-1)[ch].reshape(1, K, 128)
        shift_p = shift.reshape(-1)[ch].reshape(1, K, 128)

        row_bytes = K * 128 * in_bytes
        tb = max(1, tile_budget // row_bytes)
        if R > 1:
            tb = min(tb, _cdiv(R, 2))     # guarantee >= 2 grid steps (v7x megacore)
        tb = min(tb, R)
        grid = (_cdiv(R, tb),)

        z_spec = pl.BlockSpec((tb, K, 128), lambda i: (i, 0, 0))
        p_spec = pl.BlockSpec((1, K, 128), lambda i: (0, 0, 0))
        o_spec = pl.BlockSpec((tb, K, 128), lambda i: (i, 0, 0))
        out_shape = jax.ShapeDtypeStruct((R, K, 128), out_dtype)
        n_elems = padded
    else:
        # Direct path: D is already a multiple of 128 (lane-dense as-is), or D is
        # so ragged that the packed pattern would be too large -> accept (tn, D).
        rows = N
        align = 8
        if rows <= align:
            tn = rows                     # full-extent block (any size allowed)
        else:
            tn = max(align, (tile_budget // (D * in_bytes) // align) * align)
            tn = min(tn, _round_up(_cdiv(rows, 2), align))   # >= 2 grid steps
        grid = (_cdiv(rows, tn),)

        z_p, scale_p, shift_p = z, scale, shift
        z_spec = pl.BlockSpec((tn, D), lambda i: (i, 0))
        p_spec = pl.BlockSpec((1, D), lambda i: (0, 0))
        o_spec = pl.BlockSpec((tn, D), lambda i: (i, 0))
        out_shape = jax.ShapeDtypeStruct((rows, D), out_dtype)
        n_elems = rows * D

    cost = pl.CostEstimate(
        flops=2 * n_elems,
        transcendentals=0,
        bytes_accessed=n_elems * (in_bytes + out_bytes) + 2 * scale_p.size * in_bytes,
    )

    x_p = pl.pallas_call(
        bn_affine_kernel,
        out_shape=out_shape,
        grid_spec=pltpu.PrefetchScalarGridSpec(
            num_scalar_prefetch=0,
            grid=grid,
            in_specs=[z_spec, p_spec, p_spec],
            out_specs=o_spec,
        ),
        compiler_params=pltpu.CompilerParams(
            dimension_semantics=("parallel",),    # no carry -> megacore-shardable
            vmem_limit_bytes=vmem_limit,
        ),
        cost_estimate=cost,
    )(z_p, scale_p, shift_p)

    if packed:
        x = x_p.reshape(-1)[:total].reshape(N, D)
    else:
        x = x_p
    return x, log_det


if __name__ == "__main__":
    key = jax.random.PRNGKey(0)
    keys = jax.random.split(key, 12)
    eps = 1e-5

    def make_case(kz, kg, kb, ks, N, D):
        z = jax.random.normal(kz, (N, D), dtype=jnp.float32)
        gamma = 0.1 * jax.random.normal(kg, (1, D), dtype=jnp.float32)
        beta = 0.1 * jax.random.normal(kb, (1, D), dtype=jnp.float32)
        # Batch stats would normally come from a prior training-mode inverse();
        # simulate deterministically from a sample batch (glue, not hot path).
        x_sample = jax.random.normal(ks, (N, D), dtype=jnp.float32)
        m = jnp.mean(x_sample, axis=0, keepdims=True)
        v = jnp.var(x_sample, axis=0, ddof=1, keepdims=True) + eps  # unbiased like torch.var
        return z, gamma, beta, m, v

    def reference(z, gamma, beta, m, v):
        x = (z - beta) * jnp.exp(-gamma) * jnp.sqrt(v) + m
        ld = jnp.sum(-gamma + 0.5 * jnp.log(v))
        return x, ld

    ok = True

    # Case 1: batch=16, dim=32 -> packed lane-dense path, single grid step.
    z, g, b, m, v = make_case(keys[0], keys[1], keys[2], keys[3], 16, 32)
    x, ld = batchnorm_forward(z, g, b, m, v, force_pallas=True)
    jax.block_until_ready((x, ld))
    xr, ldr = reference(z, g, b, m, v)
    ok &= bool(jnp.allclose(x, xr, atol=1e-5, rtol=1e-5))
    ok &= bool(jnp.allclose(ld, ldr, atol=1e-5, rtol=1e-5))

    # Case 2: batch=40, dim=96 (ragged vs 128) -> packed path with a repeating
    # (K,128) channel pattern and a 2-step grid.
    z, g, b, m, v = make_case(keys[4], keys[5], keys[6], keys[7], 40, 96)
    x, ld = batchnorm_forward(z, g, b, m, v, force_pallas=True)
    jax.block_until_ready((x, ld))
    xr, ldr = reference(z, g, b, m, v)
    ok &= bool(jnp.allclose(x, xr, atol=1e-5, rtol=1e-5))
    ok &= bool(jnp.allclose(ld, ldr, atol=1e-5, rtol=1e-5))

    # Case 3: batch=32, dim=128 -> direct lane-dense path (no repack), 2-step grid.
    z, g, b, m, v = make_case(keys[8], keys[9], keys[10], keys[11], 32, 128)
    x, ld = batchnorm_forward(z, g, b, m, v, force_pallas=True)
    jax.block_until_ready((x, ld))
    xr, ldr = reference(z, g, b, m, v)
    ok &= bool(jnp.allclose(x, xr, atol=1e-5, rtol=1e-5))
    ok &= bool(jnp.allclose(ld, ldr, atol=1e-5, rtol=1e-5))

    assert ok
    print("KERNEL_OK")
</pallas_src>

<mosaic_0001>
module attributes {stable_mosaic.version = 11 : i64} {
  func.func @bn_affine_kernel(%arg0: i32, %arg1: memref<1x8x128xf32, #tpu.memory_space<vmem>>, %arg2: memref<1x8x128xf32, #tpu.memory_space<vmem>>, %arg3: memref<1x8x128xf32, #tpu.memory_space<vmem>>, %arg4: memref<1x8x128xf32, #tpu.memory_space<vmem>>) attributes {dimension_semantics = [#tpu.dimension_semantics<parallel>], iteration_bounds = array<i64: 1>, scalar_prefetch = 0 : i64, scratch_operands = 0 : i64, tpu.core_type = #tpu.core_type<tc>, window_params = [{transform_indices = @transform_0, window_bounds = array<i64: 1, 8, 128>}, {pipeline_mode = #tpu.pipeline_mode<synchronous>, transform_indices = @transform_1, window_bounds = array<i64: 1, 8, 128>}, {pipeline_mode = #tpu.pipeline_mode<synchronous>, transform_indices = @transform_2, window_bounds = array<i64: 1, 8, 128>}, {transform_indices = @transform_3, window_bounds = array<i64: 1, 8, 128>}]} {
    %c0 = arith.constant 0 : index
    %c0_0 = arith.constant 0 : index
    %c0_1 = arith.constant 0 : index
    %0 = vector.load %arg1[%c0, %c0_0, %c0_1] : memref<1x8x128xf32, #tpu.memory_space<vmem>>, vector<1x8x128xf32>
    %c0_2 = arith.constant 0 : index
    %c0_3 = arith.constant 0 : index
    %c0_4 = arith.constant 0 : index
    %1 = vector.load %arg2[%c0_2, %c0_3, %c0_4] : memref<1x8x128xf32, #tpu.memory_space<vmem>>, vector<1x8x128xf32>
    %2 = arith.mulf %0, %1 : vector<1x8x128xf32>
    %c0_5 = arith.constant 0 : index
    %c0_6 = arith.constant 0 : index
    %c0_7 = arith.constant 0 : index
    %3 = vector.load %arg3[%c0_5, %c0_6, %c0_7] : memref<1x8x128xf32, #tpu.memory_space<vmem>>, vector<1x8x128xf32>
    %4 = arith.addf %2, %3 : vector<1x8x128xf32>
    %c0_8 = arith.constant 0 : index
    %c0_9 = arith.constant 0 : index
    %c0_10 = arith.constant 0 : index
    %5 = vector.load %arg4[%c0_8, %c0_9, %c0_10] : memref<1x8x128xf32, #tpu.memory_space<vmem>>, vector<1x8x128xf32>
    tpu.vector_store %arg4[%c0_8, %c0_9, %c0_10], %4 {strides = array<i32>} : memref<1x8x128xf32, #tpu.memory_space<vmem>>, vector<1x8x128xf32>,
    return
  }
  func.func @transform_0(%arg0: i32) -> (i32, i32, i32) {
    %c0_i32 = arith.constant 0 : i32
    %c0_i32_0 = arith.constant 0 : i32
    %c0_i32_1 = arith.constant 0 : i32
    return %arg0, %c0_i32, %c0_i32_0 : i32, i32, i32
  }
  func.func @transform_1(%arg0: i32) -> (i32, i32, i32) {
    %c0_i32 = arith.constant 0 : i32
    %c0_i32_0 = arith.constant 0 : i32
    %c0_i32_1 = arith.constant 0 : i32
    %c0_i32_2 = arith.constant 0 : i32
    return %c0_i32, %c0_i32_0, %c0_i32_1 : i32, i32, i32
  }
  func.func @transform_2(%arg0: i32) -> (i32, i32, i32) {
    %c0_i32 = arith.constant 0 : i32
    %c0_i32_0 = arith.constant 0 : i32
    %c0_i32_1 = arith.constant 0 : i32
    %c0_i32_2 = arith.constant 0 : i32
    return %c0_i32, %c0_i32_0, %c0_i32_1 : i32, i32, i32
  }
  func.func @transform_3(%arg0: i32) -> (i32, i32, i32) {
    %c0_i32 = arith.constant 0 : i32
    %c0_i32_0 = arith.constant 0 : i32
    %c0_i32_1 = arith.constant 0 : i32
    return %arg0, %c0_i32, %c0_i32_0 : i32, i32, i32
  }
}

</mosaic_0001>

<bundles_post_ra>
// kernel: tpu_custom_call.1
= control target key start
LH: loop header
LB: loop body
LE: loop exit
PB: predicated region body
PF: predicated region fallthrough
CT: control target
= control target key end

     0   :  { %8 = vsyncpa [#allocation3], 0  ;;  %s242_s0 = inlined_call_operand.hbm [shape: f32[1,8,128], index: 0, kind: input, shape index: {}]   ;;  %s243_s1 = inlined_call_operand.hbm [shape: f32[1,8,128], index: 1, kind: input, shape index: {}]   ;;  %s244_s2 = inlined_call_operand.hbm [shape: f32[1,8,128], index: 2, kind: input, shape index: {}]   ;;  %s245_s3 = inlined_call_operand.hbm [shape: f32[1,8,128], index: 3, kind: output, shape index: {}]  }
   0x1   :  { %9 = vsyncpa [#allocation6], 0 }
   0x2   :  { %10 = vsyncpa [#allocation4], 0  ;;  %s170_s12 = smov [#allocation5]   ;;  %s171_s14 = smov [#allocation2]  }
   0x3   :  { %s27_s13 = sshll.u32 %s170_s12, 4  ;;  %s17_s15 = sshll.u32 %s171_s14, 4  ;;  %s28_s13 = int_to_ptr.vmem [resolvable:$true] %s27_s13  ;;  %s18_s15 = int_to_ptr.vmem [resolvable:$true] %s17_s15 }
   0x4   :  { %s76_s18 = scalar_lea.hbm %s243_s1, 128 }
   0x5   :  { %p77_p0 = scmp.ne.s32.totalorder %s243_s1, %s76_s18  ;;  %p80_p1 = scmp.lt.u32.totalorder %s76_s18, %s243_s1 }
   0x7   :  { %p82_p2 = pnand %p80_p1, %p77_p0 }
   0x9   :  { %85 = shalt.err (!%p82_p2)
}
   0xa   :  { %s86_s23 = scalar_lea.vmem %s28_s13, 128  ;;  %p91_p4 = scmp.lt.s32.totalorder %s28_s13, %s28_s13 }
   0xb   :  { %p87_p3 = scmp.ne.s32.totalorder %s28_s13, %s86_s23  ;;  %p92_p5 = scmp.lt.s32.totalorder %s86_s23, %s86_s23 }
   0xd   :  { %p93_p6 = por %p92_p5, %p91_p4 }
   0xf   :  { %p94_p7 = pnand %p93_p6, %p87_p3 }
  0x11   :  { %97 = shalt.err (!%p94_p7)
}
  0x12   :  { %30 = dma.hbm_to_vmem [thread:$0]  %s243_s1, 128, %s28_s13, [#allocation6]  }
  0x13   :  { %s98_s28 = scalar_lea.hbm %s242_s0, 128 }
  0x14   :  { %p99_p8 = scmp.ne.s32.totalorder %s242_s0, %s98_s28  ;;  %p102_p9 = scmp.lt.u32.totalorder %s98_s28, %s242_s0 }
  0x16   :  { %p104_p10 = pnand %p102_p9, %p99_p8 }
  0x18   :  { %107 = shalt.err (!%p104_p10)
}
  0x19   :  { %s108_s6 = scalar_lea.vmem %s18_s15, 128  ;;  %p113_p12 = scmp.lt.s32.totalorder %s18_s15, %s18_s15 }
  0x1a   :  { %p109_p11 = scmp.ne.s32.totalorder %s18_s15, %s108_s6  ;;  %p114_p13 = scmp.lt.s32.totalorder %s108_s6, %s108_s6 }
  0x1c   :  { %p115_p0 = por %p114_p13, %p113_p12 }
  0x1e   :  { %p116_p1 = pnand %p115_p0, %p109_p11 }
  0x20   :  { %119 = shalt.err (!%p116_p1)
}
  0x21   :  { %20 = dma.hbm_to_vmem [thread:$0]  %s242_s0, 128, %s18_s15, [#allocation3]  }
  0x22   :  { %s172_s8 = smov [#allocation7]   ;;  %s120_s12 = scalar_lea.hbm %s244_s2, 128 }
  0x23   :  { %s37_s9 = sshll.u32 %s172_s8, 4  ;;  %p121_p2 = scmp.ne.s32.totalorder %s244_s2, %s120_s12  ;;  %s38_s9 = int_to_ptr.vmem [resolvable:$true] %s37_s9 }
  0x24   :  { %p124_p3 = scmp.lt.u32.totalorder %s120_s12, %s244_s2 }
  0x26   :  { %p126_p4 = pnand %p124_p3, %p121_p2 }
  0x28   :  { %129 = shalt.err (!%p126_p4)
}
  0x29   :  { %s130_s18 = scalar_lea.vmem %s38_s9, 128  ;;  %p135_p6 = scmp.lt.s32.totalorder %s38_s9, %s38_s9 }
  0x2a   :  { %p131_p5 = scmp.ne.s32.totalorder %s38_s9, %s130_s18  ;;  %p136_p7 = scmp.lt.s32.totalorder %s130_s18, %s130_s18 }
  0x2c   :  { %p137_p8 = por %p136_p7, %p135_p6 }
  0x2e   :  { %p138_p9 = pnand %p137_p8, %p131_p5 }
  0x30   :  { %141 = shalt.err (!%p138_p9)
}
  0x31   :  { %40 = dma.hbm_to_vmem [thread:$0]  %s244_s2, 128, %s38_s9, [#allocation6]  }
  0x32   :  { %164 = dma.done.wait [#allocation3], 128  }
  0x33   :  { %165 = vsyncadd [#allocation3], 4294967168 }
  0x34   :  { %166 = dma.done.wait [#allocation6], 256  }
  0x35   :  { %167 = vsyncadd [#allocation6], 4294967040  ;;  %v50_v0 = vld [vmem:[#allocation2] sm:$0xff]  ;;  %v51_v1 = vld [vmem:[#allocation5] sm:$0xff]  ;;  %s173_s19 = smov [#allocation8]  }
  0x36   :  { %v53_v2 = vld [vmem:[#allocation7] sm:$0xff]  ;;  %s62_s20 = sshll.u32 %s173_s19, 4  ;;  %v52_v3 = vmul.f32 %v51_v1, %v50_v0  ;;  %s63_s20 = int_to_ptr.vmem [resolvable:$true] %s62_s20 }
  0x37   :  { %s142_s21 = scalar_lea.vmem %s63_s20, 128  ;;  %p147_p11 = scmp.lt.s32.totalorder %s63_s20, %s63_s20 }
  0x38   :  { %v54_v4 = vadd.f32 %v53_v2, %v52_v3  ;;  %p143_p10 = scmp.ne.s32.totalorder %s63_s20, %s142_s21  ;;  %p148_p12 = scmp.lt.s32.totalorder %s142_s21, %s142_s21 }
  0x3a   :  { %55 = vst [vmem:[#allocation8] sm:$0xff] %v54_v4  ;;  %p149_p13 = por %p148_p12, %p147_p11 }
  0x3c   :  { %p150_p0 = pnand %p149_p13, %p143_p10 }
  0x3e   :  { %153 = shalt.err (!%p150_p0)
}
  0x3f   :  { %s154_s23 = scalar_lea.hbm %s245_s3, 128 }
  0x40   :  { %p155_p1 = scmp.ne.s32.totalorder %s245_s3, %s154_s23  ;;  %p158_p2 = scmp.lt.u32.totalorder %s154_s23, %s245_s3 }
  0x42   :  { %p160_p3 = pnand %p158_p2, %p155_p1 }
  0x44   :  { %163 = shalt.err (!%p160_p3)
}
  0x45   :  { %65 = dma.vmem_to_hbm [thread:$0]  %s63_s20, 128, %s245_s3, [#allocation4]  }
  0x46   :  { %168 = dma.done.wait [#allocation4], 128  }
  0x47   :  { %169 = vsyncadd [#allocation4], 4294967168 }
  0x48   :  { %69 = vsyncpa [#allocation3], 1 }
  0x49   :  { %70 = vsyncpa [#allocation6], 1 }
  0x4a   :  { %71 = vsyncpa [#allocation4], 1 }

</bundles_post_ra>
